<compile_context>
chip_gen: v6e
topology: v6e:2x2x1
jax: 0.10.0
libtpu: 0.0.40
codegen_flags: <defaults>
</compile_context>

<pallas_src>
import jax
import jax.numpy as jnp
from jax.experimental import pallas as pl
from jax.experimental.pallas import tpu as pltpu

_LOG2E = 1.4426950408889634
_LANES = 128


def _gaussian_act_kernel(c_ref, x_ref, o_ref):
    # c_ref: (1, 1) f32 scalar in SMEM holding -0.5 * log2(e) / a^2
    # x_ref / o_ref: (block_rows, 128) tiles in VMEM, native input dtype.
    # NOTE: on a partial last grid block the out-of-bounds region of the input
    # tile holds unspecified data; exp2 may produce inf/0 there, which is
    # harmless (masked writeback, no FP traps) -- do not "fix" by masking.
    c = c_ref[0, 0]
    x = x_ref[...].astype(jnp.float32)   # f32 compute (v5e VPU/EUP: no bf16)
    o_ref[...] = jnp.exp2(x * x * c).astype(o_ref.dtype)


def gaussian_act(x, a, *, block_rows=4096, min_pallas_elems=65536,
                 force_pallas=False):
    """Elementwise gaussian activation exp(-0.5 x^2 / a^2). x: any shape."""
    orig_shape = x.shape
    dtype = x.dtype
    n = x.size

    a32 = jnp.asarray(a, jnp.float32)
    # exp(-0.5 x^2 / a^2) == exp2(x^2 * c), c = -0.5*log2(e)/a^2
    c32 = jnp.float32(-0.5 * _LOG2E) / (a32 * a32)

    def _jnp_path(v):
        vf = v.astype(jnp.float32)
        return jnp.exp2(vf * vf * c32).astype(dtype)

    n_bulk = (n // _LANES) * _LANES
    # Tiny tensors: custom-call + reshape plumbing overhead dominates; let XLA
    # fuse a plain elementwise op with its neighbors instead.
    if n_bulk == 0 or (n < min_pallas_elems and not force_pallas):
        return _jnp_path(x)

    x_flat = jnp.ravel(x)                     # free for contiguous layouts
    rows = n_bulk // _LANES
    itemsize = int(jnp.dtype(dtype).itemsize)
    # dtype-aware sublane multiple: 8 (f32), 16 (bf16/f16), 32 (int8/fp8)
    sublane = max(8, 32 // max(itemsize, 1))

    if rows <= sublane:
        br = rows                              # block == full sublane extent
    else:
        # Cap the block so the 1-D "parallel" grid has >= ~4 steps, letting
        # v7x shard the axis across both TensorCores; then round to the
        # sublane multiple. cdiv grid handles the partial last block.
        target = min(block_rows, rows, pl.cdiv(rows, 4))
        br = max(sublane, (target // sublane) * sublane)
        br = min(br, (rows // sublane) * sublane)
    grid = (pl.cdiv(rows, br),)

    if n_bulk != n:
        x2d = jax.lax.slice(x_flat, (0,), (n_bulk,)).reshape(rows, _LANES)
    else:
        x2d = x_flat.reshape(rows, _LANES)

    c = c32.reshape(1, 1)

    # Raise the scoped-VMEM cap only when large blocks need it; keep headroom
    # under v7x's 64 MiB physical VMEM.
    buf_bytes = 2 * 2 * br * _LANES * itemsize   # {in,out} x double-buffered
    cp_kwargs = dict(dimension_semantics=("parallel",))
    if buf_bytes > 12 * 1024 * 1024:
        cp_kwargs["vmem_limit_bytes"] = int(min(2 * buf_bytes, 48 * 1024 * 1024))

    out2d = pl.pallas_call(
        _gaussian_act_kernel,
        out_shape=jax.ShapeDtypeStruct((rows, _LANES), dtype),
        grid_spec=pltpu.PrefetchScalarGridSpec(
            num_scalar_prefetch=0,
            grid=grid,
            in_specs=[
                pl.BlockSpec(memory_space=pltpu.SMEM),           # scalar c
                pl.BlockSpec((br, _LANES), lambda i: (i, 0)),    # x tile
            ],
            out_specs=pl.BlockSpec((br, _LANES), lambda i: (i, 0)),
        ),
        compiler_params=pltpu.CompilerParams(**cp_kwargs),
    )(c, x2d)

    out_flat = out2d.reshape(-1)
    if n_bulk != n:
        # <128-element ragged tail handled with plain jnp (no full-array pad
        # concatenate and no full-array output slice).
        tail = _jnp_path(jax.lax.slice(x_flat, (n_bulk,), (n,)))
        out_flat = jnp.concatenate([out_flat, tail], axis=0)
    return out_flat.reshape(orig_shape)


if __name__ == "__main__":
    k0, k1 = jax.random.split(jax.random.PRNGKey(0))

    # NCHW input, small shapes consistent with the module: batch=2, channels=4,
    # spatial=16x16. Force the Pallas path so the kernel itself is exercised
    # (2048 elements -> 16 rows -> 2 grid steps).
    x = jax.random.normal(k0, (2, 4, 16, 16), dtype=jnp.float32)
    a = jnp.float32(0.01)                      # matches nn.Parameter default
    y = jax.block_until_ready(gaussian_act(x, a, force_pallas=True))
    y_ref = jnp.exp(-0.5 * x ** 2 / a ** 2)
    assert y.shape == x.shape and y.dtype == x.dtype
    assert jnp.allclose(y, y_ref, rtol=1e-5, atol=1e-6), "mismatch (small case)"

    # Larger ragged-length input (n % 128 != 0): exercises the multi-step grid
    # and the jnp tail path. a=0.5 keeps outputs away from underflow.
    x2 = jax.random.normal(k1, (517, 333), dtype=jnp.float32)
    a2 = jnp.float32(0.5)
    y2 = jax.block_until_ready(gaussian_act(x2, a2))
    y2_ref = jnp.exp(-0.5 * x2 ** 2 / a2 ** 2)
    assert y2.shape == x2.shape and y2.dtype == x2.dtype
    assert jnp.allclose(y2, y2_ref, rtol=1e-5, atol=1e-6), "mismatch (ragged)"

    print("KERNEL_OK")
</pallas_src>

<mosaic_0001>
module attributes {stable_mosaic.version = 11 : i64} {
  func.func @_gaussian_act_kernel(%arg0: i32, %arg1: memref<1x1xf32, #tpu.memory_space<smem>>, %arg2: memref<8x128xf32, #tpu.memory_space<vmem>>, %arg3: memref<8x128xf32, #tpu.memory_space<vmem>>) attributes {dimension_semantics = [#tpu.dimension_semantics<parallel>], iteration_bounds = array<i64: 2>, scalar_prefetch = 0 : i64, scratch_operands = 0 : i64, tpu.core_type = #tpu.core_type<tc>, window_params = [{transform_indices = @transform_0, window_bounds = array<i64: 1, 1>}, {transform_indices = @transform_1, window_bounds = array<i64: 8, 128>}, {transform_indices = @transform_2, window_bounds = array<i64: 8, 128>}]} {
    %c0 = arith.constant 0 : index
    %c0_0 = arith.constant 0 : index
    %0 = memref.load %arg1[%c0, %c0_0] : memref<1x1xf32, #tpu.memory_space<smem>>
    %c0_1 = arith.constant 0 : index
    %c0_2 = arith.constant 0 : index
    %1 = vector.load %arg2[%c0_1, %c0_2] : memref<8x128xf32, #tpu.memory_space<vmem>>, vector<8x128xf32>
    %2 = arith.mulf %1, %1 : vector<8x128xf32>
    %3 = vector.broadcast %0 : f32 to vector<8x128xf32>
    %4 = arith.mulf %2, %3 : vector<8x128xf32>
    %5 = math.exp2 %4 : vector<8x128xf32>
    %c0_3 = arith.constant 0 : index
    %c0_4 = arith.constant 0 : index
    %6 = vector.load %arg3[%c0_3, %c0_4] : memref<8x128xf32, #tpu.memory_space<vmem>>, vector<8x128xf32>
    tpu.vector_store %arg3[%c0_3, %c0_4], %5 {strides = array<i32>} : memref<8x128xf32, #tpu.memory_space<vmem>>, vector<8x128xf32>,
    return
  }
  func.func @transform_0(%arg0: i32) -> (i32, i32) {
    %c0_i32 = arith.constant 0 : i32
    %c0_i32_0 = arith.constant 0 : i32
    %c0_i32_1 = arith.constant 0 : i32
    return %c0_i32, %c0_i32_0 : i32, i32
  }
  func.func @transform_1(%arg0: i32) -> (i32, i32) {
    %c0_i32 = arith.constant 0 : i32
    %c0_i32_0 = arith.constant 0 : i32
    return %arg0, %c0_i32 : i32, i32
  }
  func.func @transform_2(%arg0: i32) -> (i32, i32) {
    %c0_i32 = arith.constant 0 : i32
    %c0_i32_0 = arith.constant 0 : i32
    return %arg0, %c0_i32 : i32, i32
  }
}

</mosaic_0001>

<bundles_post_ra>
// kernel: tpu_custom_call.1
= control target key start
LH: loop header
LB: loop body
LE: loop exit
PB: predicated region body
PF: predicated region fallthrough
CT: control target
= control target key end

     0   :  { %s572_s0 = inlined_call_operand.<no memory space> [shape: f32[1,1], index: 0, kind: input, shape index: {}]   ;;  %s573_s1 = inlined_call_operand.hbm [shape: f32[16,128], index: 1, kind: input, shape index: {}]   ;;  %s574_s2 = inlined_call_operand.hbm [shape: f32[16,128], index: 2, kind: output, shape index: {}]  }
   0x1   :  { %7 = sst [smem:[#allocation2]] %s572_s0 }
   0x2   :  { %8 = vsyncpa [#allocation4], 0 }
   0x3   :  { %10 = vsyncpa [#allocation4 + $0x1], 0 }
   0x4   :  { %11 = vsyncpa [#allocation5], 0 }
   0x5   :  { %13 = vsyncpa [#allocation5 + $0x1], 0  ;;  %s425_s11 = smov 0   ;;  %s427_s12 = smov 0  }
   0x6   :  { %s429_s13 = smov 0   ;;  %s431_s14 = smov 0  }
   0x7 LB: > { %s446_s0 = sadd.s32 4294967295, %s403_s14   ;;  %s251_s15 = sadd.s32 4294967294, %s403_s14   ;;  %s403_s14 = sphi %s431_s14, %s591_s14   ;;  %s399_s13 = sphi %s429_s13, %s590_s13   ;;  %s395_s12 = sphi %s427_s12, %s589_s12   ;;  %s391_s11 = sphi %s425_s11, %s588_s11  }
   0x8   : > { %s450_s16 = sadd.s32 1, %s403_s14   ;;  %s47_s17 = sadd.s32 1, %s399_s13 }
   0x9   : > { %s44_s18 = ssub.s32 %s403_s14, %s450_s16  ;;  %p54_p0 = scmp.ne.s32.totalorder %s399_s13, %s395_s12 }
   0xa   : > { %p45_p1 = scmp.eq.s32.totalorder %s44_s18, 0  ;;  %p55_p2 = scmp.eq.s32.totalorder %s403_s14, 0 }
   0xb   : > { %p60_p3 = scmp.ne.s32.totalorder %s395_s12, %s391_s11  ;;  %p61_p4 = scmp.eq.s32.totalorder %s446_s0, 0 }
   0xc   : > { %s462_s19 = scalar_select %p45_p1, %s399_s13, %s47_s17  }
   0xd   : > { %p464_p5 = por %p55_p2, %p54_p0  ;;  %p468_p6 = por %p61_p4, %p60_p3 }
   0xe   : > { %p84_p7 = scmp.eq.s32.totalorder %s446_s0, 1  ;;  %p90_p8 = scmp.eq.s32.totalorder %s251_s15, 1 }
   0xf   : > { %s578_s21 = scalar_select %p468_p6, 1, 0 }
  0x10   : > { %p275_p10 = scmp.lt.s32.totalorder %s403_s14, 2  ;;  %p475_p11 = por %p84_p7, %p54_p0 }
  0x11   : > { %p479_p12 = por %p90_p8, %p60_p3  ;;  %s113_s24 = sand.u32 1, %s399_s13  }
  0x12   : > { %s579_s22 = scalar_select %p475_p11, 1, 0 }
  0x13   : > { %s580_s23 = scalar_select %p479_p12, 1, 0 }
  0x14   : > { %s255_s25 = sshll.u32 %s403_s14, 7  ;;  %s254_s26 = sshll.u32 %s113_s24, 3 }
  0x15   : > { %s488_s29 = scalar_lea.hbm %s573_s1, %s255_s25  ;;  %s117_s30 = scalar_lea.vmem [#allocation3], %s254_s26 }
  0x16   : > { %s124_s3 = sshll.u32 %s117_s30, 4  ;;  %p492_p13 = pnand %p275_p10, %p464_p5  ;;  %s496_s3 = int_to_ptr.vmem [resolvable:$true] %s124_s3 }
  0x17   : > { %s114_s5 = scalar_lea.sflag [#allocation4], %s113_s24  ;;  %s311_s6 = scalar_lea.hbm %s488_s29, 128 }
  0x18   : > { %p312_p2 = scmp.ne.s32.totalorder %s488_s29, %s311_s6  ;;  %p313_p3 = pneg %p492_p13 }
  0x19   : > { %s316_s9 = scalar_lea.hbm %s573_s1, 256  ;;  %p317_p5 = scmp.lt.s32.totalorder %s488_s29, %s573_s1 }
  0x1a   : > { %p314_p4 = pnand %p313_p3, %p312_p2  ;;  %p318_p8 = scmp.lt.s32.totalorder %s316_s9, %s311_s6 }
  0x1c   : > { %p315_p7 = pneg %p314_p4  ;;  %p319_p10 = por %p318_p8, %p317_p5 }
  0x1e   : > { %p320_p9 = pnand %p319_p10, %p315_p7 }
  0x20   : > { %323 = shalt.err (!%p320_p9)
}
  0x21   : > { %s324_s17 = scalar_lea.vmem %s496_s3, 128  ;;  %s405_s18 = smov [#allocation3]  }
  0x22   : > { %p325_p0 = scmp.ne.s32.totalorder %s496_s3, %s324_s17  ;;  %s329_s20 = sshll.u32 %s405_s18, 4  ;;  %s330_s20 = int_to_ptr.vmem [resolvable:$false] %s329_s20 }
  0x23   : > { %s331_s24 = scalar_lea.vmem %s330_s20, 256  ;;  %p332_p4 = scmp.lt.s32.totalorder %s496_s3, %s330_s20 }
  0x24   : > { %p327_p1 = pnand %p325_p0, %p313_p3  ;;  %p333_p12 = scmp.lt.s32.totalorder %s331_s24, %s324_s17 }
  0x26   : > { %p328_p2 = pneg %p327_p1  ;;  %p334_p11 = por %p333_p12, %p332_p4 }
  0x28   : > { %p335_p6 = pnand %p334_p11, %p328_p2 }
  0x2a   : > { %338 = shalt.err (!%p335_p6)
}
  0x2b   : > { %270 = dma.hbm_to_vmem [thread:$0]  (!%p492_p13), %s488_s29, 128, %s496_s3, %s114_s5  }
  0x2c   : > { %p582_p9 = scmp.lt.s32.totalorder %s403_s14, 3  ;;  %p583_p7 = scmp.ge.s32.totalorder %s403_s14, 1 }
  0x2e   : > { %p130_p0 = pnand %p583_p7, %p582_p9 }
  0x2f   : > { %s523_s25 = sand.u32 (!%p130_p0), 1, %s395_s12   ;;  %p584_p6 = scmp.ne.s32.totalorder (!%p130_p0), %s578_s21, 0 }
  0x30   : > { %133 = sbr.rel (%p130_p0) target bundleno = 90 (0x5a), region = 28  ;;  %s257_s26 = sshll.u32 (!%p130_p0), %s523_s25, 3 }
  0x31   : > { %s136_s27 = scalar_lea.sflag (!%p130_p0), [#allocation4], %s523_s25  ;;  %s139_s28 = scalar_lea.vmem (!%p130_p0), [#allocation3], %s257_s26 }
  0x35   : > { %382 = dma.done.wait (%p584_p6), %s136_s27, 128  }
  0x36   : > { %384 = vsyncadd (%p584_p6), %s136_s27, 4294967168  ;;  %s160_s29 = sld [smem:[#allocation2]]  ;;  %v161_v0 = vld [vmem:[%s139_s28] sm:$0xff]  ;;  %s159_s30 = scalar_lea.vmem [#allocation6], %s257_s26 }
  0x37   : > { %v162_v2 = vmul.f32 %v161_v0, %v161_v0  ;;  %s181_s3 = sshll.u32 %s159_s30, 4  ;;  %s260_s4 = sshll.u32 %s446_s0, 7  ;;  %s532_s3 = int_to_ptr.vmem [resolvable:$true] %s181_s3 }
  0x38   : > { %s179_s21 = scalar_lea.hbm %s574_s2, %s260_s4  ;;  %s168_s7 = scalar_lea.sflag [#allocation5], %s523_s25 }
  0x39   : > { %s339_s8 = scalar_lea.vmem %s532_s3, 128  ;;  %p585_p12 = scmp.ne.s32.totalorder %s579_s22, 0 }
  0x3a   : > { %p340_p11 = scmp.ne.s32.totalorder %s532_s3, %s339_s8  ;;  %s406_s9 = smov [#allocation6]  }
  0x3b   : > { %s343_s10 = sshll.u32 %s406_s9, 4  ;;  %s344_s10 = int_to_ptr.vmem [resolvable:$false] %s343_s10 }
  0x3c   : > { %v163_v1 = vstv %s160_s29  ;;  %p341_p13 = pnand %p340_p11, %p585_p12  ;;  %s345_s0 = scalar_lea.vmem %s344_s10, 256 }
  0x3d   : > { %v164_v3 = vmul.f32 %v163_v1, %v162_v2  ;;  %p346_p3 = scmp.lt.s32.totalorder %s532_s3, %s344_s10  ;;  %p347_p5 = scmp.lt.s32.totalorder %s345_s0, %s339_s8 }
  0x3e   : > { %p342_p1 = pneg %p341_p13 }
  0x3f   : > { %309 = vpow2.f32 %v164_v3  ;;  %p348_p8 = por %p347_p5, %p346_p3 }
  0x41   : > { %p349_p10 = pnand %p348_p8, %p342_p1 }
  0x4c   : > { %v310_v4 = vpop.eup %309 }
  0x4d   : > { %166 = vst [vmem:[%s159_s30] sm:$0xff] %v310_v4 }
  0x4e   : > { %352 = shalt.err (!%p349_p10)
}
  0x4f   : > { %s353_s15 = scalar_lea.hbm %s179_s21, 128  ;;  %s357_s20 = scalar_lea.hbm %s574_s2, 256 }
  0x50   : > { %p354_p2 = scmp.ne.s32.totalorder %s179_s21, %s353_s15  ;;  %p358_p7 = scmp.lt.s32.totalorder %s179_s21, %s574_s2 }
  0x51   : > { %p359_p0 = scmp.lt.s32.totalorder %s357_s20, %s353_s15 }
  0x52   : > { %p355_p4 = pnand %p354_p2, %p585_p12 }
  0x53   : > { %p360_p6 = por %p359_p0, %p358_p7 }
  0x54   : > { %p356_p9 = pneg %p355_p4 }
  0x56   : > { %p361_p11 = pnand %p360_p6, %p356_p9 }
  0x58   : > { %364 = shalt.err (!%p361_p11)
}
  0x59   : > { %265 = dma.vmem_to_hbm [thread:$0]  (%p585_p12), %s532_s3, 128, %s179_s21, %s168_s7  }
  0x5a PF: > { %s193_s26 = sand.u32 1, %s391_s11   ;;  %p586_p13 = scmp.ne.s32.totalorder %s580_s23, 0 }
  0x5b   : > { %p587_p1 = scmp.ge.s32.totalorder %s403_s14, 2  ;;  %s194_s27 = scalar_lea.sflag [#allocation5], %s193_s26 }
  0x5d   : > { %p272_p3 = pnand %p587_p1, %p586_p13 }
  0x5f   : > { %p273_p5 = pneg %p272_p3 }
  0x61   : > { %386 = dma.done.wait (%p273_p5), %s194_s27, 128  }
  0x62   : > { %388 = vsyncadd (%p273_p5), %s194_s27, 4294967168  ;;  %p16_p8 = scmp.ge.s32.totalorder %s450_s16, 4   ;;  %s588_s11 = smov %s395_s12 }
  0x63   : > { %s589_s12 = smov %s399_s13  ;;  %s590_s13 = smov %s462_s19 }
  0x64   : > { %s591_s14 = smov %s450_s16  ;;  %18 = sbr.rel (!%p16_p8) target bundleno = 7 (0x7), region = 73 }
  0x69   :  { %199 = vsyncpa [#allocation4], 1 }
  0x6a   :  { %201 = vsyncpa [#allocation4 + $0x1], 1 }
  0x6b   :  { %202 = vsyncpa [#allocation5], 1 }
  0x6c   :  { %204 = vsyncpa [#allocation5 + $0x1], 1 }

</bundles_post_ra>
